<compile_context>
chip_gen: v6e
topology: v6e:2x2x1
jax: 0.10.0
libtpu: 0.0.40
codegen_flags: <defaults>
</compile_context>

<pallas_src>
import functools
import math

import numpy as np

import jax
import jax.numpy as jnp
from jax import lax
from jax.experimental import pallas as pl
from jax.experimental.pallas import tpu as pltpu


# ----------------------------- device helpers -------------------------------

def _device_kind():
    try:
        return jax.devices()[0].device_kind.lower()
    except Exception:
        return ""


def _is_v7():
    k = _device_kind()
    return ("v7" in k) or ("tpu7" in k) or ("7x" in k)


def _auto_compute_dtype():
    k = _device_kind()
    if any(t in k for t in ("v6", "6e", "v7", "tpu7", "7x")):
        return jnp.bfloat16          # bf16-native MXU generations
    return jnp.float32


# --------------------------------- kernel -----------------------------------

def _conv_narrow_kernel(x_ref, w_ref, b_ref, o_ref, pm_ref, *,
                        Nb, Cin_p, Wp, Mq):
    """Fused 3x3 conv (pad=1) + bias; one im2col matmul over the batch tile.

    x_ref : (Nb, Cin_p, (H+3)*Wp)  zero-padded, spatially-flattened input
    w_ref : (Cout_p, 9*Cin_p)      im2col weight matrix
    b_ref : (Cout_p, 1)            f32 bias column
    o_ref : (Nb, Cout_p, Mq)       full-channel output (narrow done in wrapper)
    pm_ref: (9*Cin_p, Nb*Mq)       VMEM im2col scratch
    """
    # im2col fill: one slab load per (image, dy); dx taps are lane shifts of
    # the loaded slab (XLU work, idle slot here) rather than 3 unaligned loads.
    # Nb is VMEM-budget-capped by the wrapper, so this static unroll stays small.
    for b in range(Nb):
        col0 = b * Mq
        for dy in range(3):
            slab = x_ref[b, :, dy * Wp: dy * Wp + Mq + 2]     # (Cin_p, Mq+2)
            for dx in range(3):
                t = dy * 3 + dx
                pm_ref[t * Cin_p:(t + 1) * Cin_p, col0:col0 + Mq] = \
                    slab[:, dx:dx + Mq]

    # One MXU matmul for the whole batch tile, f32 accumulation.
    acc = jnp.dot(w_ref[...], pm_ref[...], preferred_element_type=jnp.float32)
    acc = acc + b_ref[...]                    # (Cout_p, 1) lane-broadcast bias

    # Lane-dense, 128-aligned, full-vreg stores (no masking).
    for b in range(Nb):
        o_ref[b] = acc[:, b * Mq:(b + 1) * Mq].astype(o_ref.dtype)


# -------------------------------- wrapper ------------------------------------

def inference_model_fast_pallas(x_nchw, weight, bias, nClasses, *,
                                compute_dtype=None):
    """x_nchw: (N, Cin, H, W); weight: (Cout, Cin, 3, 3); bias: (Cout,)."""
    N, Cin, H, W = x_nchw.shape
    Cout = weight.shape[0]
    assert weight.shape == (Cout, Cin, 3, 3)
    assert 0 < nClasses <= Cout

    if compute_dtype is None:
        compute_dtype = _auto_compute_dtype()
    in_bytes = np.dtype(compute_dtype).itemsize
    out_dtype = x_nchw.dtype
    out_bytes = np.dtype(out_dtype).itemsize

    # --- layout sizes --------------------------------------------------------
    # Pad width so the flattened spatial dim (lanes) is a multiple of 128
    # (unmasked vst, no lane padding in VMEM).  Need Wp >= W+2 for the halo.
    lane_step = 128 // math.gcd(H, 128)
    Wp = -(-(W + 2) // lane_step) * lane_step
    Mq = H * Wp                               # per-image flat columns, %128==0
    Sp = (H + 3) * Wp                         # flat padded-input length
    sub = 8 if in_bytes == 4 else 16          # sublane(-packing) granule
    Cin_p = -(-Cin // sub) * sub
    Cout_p = -(-Cout // 8) * 8                # full 8-sublane output rows

    # --- wrapper glue (layout only; output needs no transpose) ---------------
    # pad: 1 top / 2 bottom / 1 left / (Wp - W - 1) right, channels to Cin_p.
    x_pad = jnp.pad(x_nchw, ((0, 0), (0, Cin_p - Cin), (1, 2), (1, Wp - W - 1)))
    x_flat = x_pad.reshape(N, Cin_p, Sp).astype(compute_dtype)

    # w_mat[c, (dy*3+dx)*Cin_p + ci] = weight[c, ci, dy, dx]
    w_mat = jnp.transpose(weight, (0, 2, 3, 1))               # (Cout,3,3,Cin)
    w_mat = jnp.pad(w_mat, ((0, Cout_p - Cout), (0, 0), (0, 0),
                            (0, Cin_p - Cin)))
    w_mat = w_mat.reshape(Cout_p, 9 * Cin_p).astype(compute_dtype)
    b_col = jnp.pad(bias, (0, Cout_p - Cout)).reshape(Cout_p, 1).astype(
        jnp.float32)

    # --- batch tiling: generation-aware & VMEM-budgeted -----------------------
    is_v7 = _is_v7()
    vmem_budget = (24 << 20) if is_v7 else (48 << 20)

    def step_bytes(nb):
        return (2 * nb * Cin_p * Sp * in_bytes          # double-buffered input
                + 2 * Cout_p * 9 * Cin_p * in_bytes     # weights
                + 9 * Cin_p * nb * Mq * in_bytes        # im2col scratch
                + 2 * nb * Cout_p * Mq * out_bytes)     # double-buffered output

    divisors = [d for d in range(1, N + 1) if N % d == 0]
    fitting = [d for d in divisors if step_bytes(d) <= vmem_budget] or [1]
    if is_v7 and N >= 2:
        # Keep >=2 parallel grid blocks so both TensorCores get work.
        two_block = [d for d in fitting if N // d >= 2]
        Nb = max(two_block) if two_block else max(fitting)
    else:
        # Single-TC chips: grid is a serial loop; minimize per-step overhead.
        Nb = max(fitting)
    grid = (N // Nb,)

    kernel = functools.partial(_conv_narrow_kernel, Nb=Nb, Cin_p=Cin_p,
                               Wp=Wp, Mq=Mq)

    cost = pl.CostEstimate(
        flops=2 * N * H * W * 9 * Cin * Cout,
        transcendentals=0,
        bytes_accessed=(x_flat.size * in_bytes + w_mat.size * in_bytes
                        + b_col.size * 4 + N * Cout_p * Mq * out_bytes),
    )

    out_flat = pl.pallas_call(
        kernel,
        out_shape=jax.ShapeDtypeStruct((N, Cout_p, Mq), out_dtype),
        grid_spec=pltpu.PrefetchScalarGridSpec(
            num_scalar_prefetch=0,
            grid=grid,
            in_specs=[
                pl.BlockSpec((Nb, Cin_p, Sp), lambda n: (n, 0, 0)),
                pl.BlockSpec((Cout_p, 9 * Cin_p), lambda n: (0, 0)),
                pl.BlockSpec((Cout_p, 1), lambda n: (0, 0)),
            ],
            out_specs=pl.BlockSpec((Nb, Cout_p, Mq), lambda n: (n, 0, 0)),
            scratch_shapes=[pltpu.VMEM((9 * Cin_p, Nb * Mq), compute_dtype)],
        ),
        compiler_params=pltpu.CompilerParams(
            dimension_semantics=("parallel",),
            vmem_limit_bytes=(32 << 20) if is_v7 else (64 << 20)),
        cost_estimate=cost,
    )(x_flat, w_mat, b_col)

    # Channels-major already (NCHW): narrow(1, 0, nClasses) + drop the padded
    # width columns are zero-cost wrapper views.
    out = out_flat.reshape(N, Cout_p, H, Wp)[:, :nClasses, :, :W]
    return out


# ------------------------------- reference -----------------------------------

def _reference(x_nchw, weight, bias, nClasses):
    """Pure-JAX reference: conv2d(pad=1) + bias, then channel narrow (NCHW)."""
    out = lax.conv_general_dilated(
        x_nchw, weight, window_strides=(1, 1), padding=((1, 1), (1, 1)),
        dimension_numbers=("NCHW", "OIHW", "NCHW"))
    out = out + bias.reshape(1, -1, 1, 1)
    return out[:, :nClasses]


if __name__ == "__main__":
    key = jax.random.PRNGKey(0)
    kx, kw, kb = jax.random.split(key, 3)

    # Small shapes consistent with the module's forward: NCHW heatmap tensor.
    N, Cin, H, W = 2, 4, 16, 16
    Cout = 8          # channels produced by the synthetic pyranet
    nClasses = 5      # out.narrow(1, 0, nClasses)

    x = jax.random.normal(kx, (N, Cin, H, W), dtype=jnp.float32)
    weight = 0.1 * jax.random.normal(kw, (Cout, Cin, 3, 3), dtype=jnp.float32)
    bias = 0.05 * jax.random.normal(kb, (Cout,), dtype=jnp.float32)

    ref = _reference(x, weight, bias, nClasses)

    # f32 compute path: tight check.
    out = inference_model_fast_pallas(x, weight, bias, nClasses,
                                      compute_dtype=jnp.float32)
    out = jax.block_until_ready(out)
    assert out.shape == (N, nClasses, H, W), out.shape
    assert jnp.allclose(out, ref, atol=1e-4, rtol=1e-4), \
        float(jnp.max(jnp.abs(out - ref)))

    # bf16 compute path (v6e/v7x fast path): looser tolerance, f32 accumulation.
    out_bf16 = inference_model_fast_pallas(x, weight, bias, nClasses,
                                           compute_dtype=jnp.bfloat16)
    out_bf16 = jax.block_until_ready(out_bf16)
    assert out_bf16.shape == (N, nClasses, H, W), out_bf16.shape
    assert jnp.allclose(out_bf16, ref, atol=5e-2, rtol=5e-2), \
        float(jnp.max(jnp.abs(out_bf16 - ref)))

    print("KERNEL_OK")
</pallas_src>

<mosaic_0001>
module attributes {stable_mosaic.version = 11 : i64} {
  func.func @_conv_narrow_kernel(%arg0: i32, %arg1: memref<2x8x456xf32, #tpu.memory_space<vmem>>, %arg2: memref<8x72xf32, #tpu.memory_space<vmem>>, %arg3: memref<8x1xf32, #tpu.memory_space<vmem>>, %arg4: memref<2x8x384xf32, #tpu.memory_space<vmem>>, %arg5: memref<72x768xf32, #tpu.memory_space<vmem>>) attributes {dimension_semantics = [#tpu.dimension_semantics<parallel>], iteration_bounds = array<i64: 1>, scalar_prefetch = 0 : i64, scratch_operands = 1 : i64, tpu.core_type = #tpu.core_type<tc>, window_params = [{transform_indices = @transform_0, window_bounds = array<i64: 2, 8, 456>}, {pipeline_mode = #tpu.pipeline_mode<synchronous>, transform_indices = @transform_1, window_bounds = array<i64: 8, 72>}, {pipeline_mode = #tpu.pipeline_mode<synchronous>, transform_indices = @transform_2, window_bounds = array<i64: 8, 1>}, {transform_indices = @transform_3, window_bounds = array<i64: 2, 8, 384>}]} {
    %c0 = arith.constant 0 : index
    %c0_0 = arith.constant 0 : index
    %c0_1 = arith.constant 0 : index
    %0 = vector.load %arg1[%c0, %c0_0, %c0_1] : memref<2x8x456xf32, #tpu.memory_space<vmem>>, vector<1x8x386xf32>
    %1 = vector.shape_cast %0 : vector<1x8x386xf32> to vector<8x386xf32>
    %2 = vector.extract_strided_slice %1 {offsets = [0, 0], sizes = [8, 384], strides = [1, 1]} : vector<8x386xf32> to vector<8x384xf32>
    %c0_2 = arith.constant 0 : index
    %c0_3 = arith.constant 0 : index
    %3 = vector.load %arg5[%c0_2, %c0_3] : memref<72x768xf32, #tpu.memory_space<vmem>>, vector<8x384xf32>
    tpu.vector_store %arg5[%c0_2, %c0_3], %2 {strides = array<i32>} : memref<72x768xf32, #tpu.memory_space<vmem>>, vector<8x384xf32>,
    %4 = vector.extract_strided_slice %1 {offsets = [0, 1], sizes = [8, 384], strides = [1, 1]} : vector<8x386xf32> to vector<8x384xf32>
    %c8 = arith.constant 8 : index
    %c0_4 = arith.constant 0 : index
    %5 = vector.load %arg5[%c8, %c0_4] : memref<72x768xf32, #tpu.memory_space<vmem>>, vector<8x384xf32>
    tpu.vector_store %arg5[%c8, %c0_4], %4 {strides = array<i32>} : memref<72x768xf32, #tpu.memory_space<vmem>>, vector<8x384xf32>,
    %6 = vector.extract_strided_slice %1 {offsets = [0, 2], sizes = [8, 384], strides = [1, 1]} : vector<8x386xf32> to vector<8x384xf32>
    %c16 = arith.constant 16 : index
    %c0_5 = arith.constant 0 : index
    %7 = vector.load %arg5[%c16, %c0_5] : memref<72x768xf32, #tpu.memory_space<vmem>>, vector<8x384xf32>
    tpu.vector_store %arg5[%c16, %c0_5], %6 {strides = array<i32>} : memref<72x768xf32, #tpu.memory_space<vmem>>, vector<8x384xf32>,
    %c0_6 = arith.constant 0 : index
    %c0_7 = arith.constant 0 : index
    %c24 = arith.constant 24 : index
    %8 = vector.load %arg1[%c0_6, %c0_7, %c24] : memref<2x8x456xf32, #tpu.memory_space<vmem>>, vector<1x8x386xf32>
    %9 = vector.shape_cast %8 : vector<1x8x386xf32> to vector<8x386xf32>
    %10 = vector.extract_strided_slice %9 {offsets = [0, 0], sizes = [8, 384], strides = [1, 1]} : vector<8x386xf32> to vector<8x384xf32>
    %c24_8 = arith.constant 24 : index
    %c0_9 = arith.constant 0 : index
    %11 = vector.load %arg5[%c24_8, %c0_9] : memref<72x768xf32, #tpu.memory_space<vmem>>, vector<8x384xf32>
    tpu.vector_store %arg5[%c24_8, %c0_9], %10 {strides = array<i32>} : memref<72x768xf32, #tpu.memory_space<vmem>>, vector<8x384xf32>,
    %12 = vector.extract_strided_slice %9 {offsets = [0, 1], sizes = [8, 384], strides = [1, 1]} : vector<8x386xf32> to vector<8x384xf32>
    %c32 = arith.constant 32 : index
    %c0_10 = arith.constant 0 : index
    %13 = vector.load %arg5[%c32, %c0_10] : memref<72x768xf32, #tpu.memory_space<vmem>>, vector<8x384xf32>
    tpu.vector_store %arg5[%c32, %c0_10], %12 {strides = array<i32>} : memref<72x768xf32, #tpu.memory_space<vmem>>, vector<8x384xf32>,
    %14 = vector.extract_strided_slice %9 {offsets = [0, 2], sizes = [8, 384], strides = [1, 1]} : vector<8x386xf32> to vector<8x384xf32>
    %c40 = arith.constant 40 : index
    %c0_11 = arith.constant 0 : index
    %15 = vector.load %arg5[%c40, %c0_11] : memref<72x768xf32, #tpu.memory_space<vmem>>, vector<8x384xf32>
    tpu.vector_store %arg5[%c40, %c0_11], %14 {strides = array<i32>} : memref<72x768xf32, #tpu.memory_space<vmem>>, vector<8x384xf32>,
    %c0_12 = arith.constant 0 : index
    %c0_13 = arith.constant 0 : index
    %c48 = arith.constant 48 : index
    %16 = vector.load %arg1[%c0_12, %c0_13, %c48] : memref<2x8x456xf32, #tpu.memory_space<vmem>>, vector<1x8x386xf32>
    %17 = vector.shape_cast %16 : vector<1x8x386xf32> to vector<8x386xf32>
    %18 = vector.extract_strided_slice %17 {offsets = [0, 0], sizes = [8, 384], strides = [1, 1]} : vector<8x386xf32> to vector<8x384xf32>
    %c48_14 = arith.constant 48 : index
    %c0_15 = arith.constant 0 : index
    %19 = vector.load %arg5[%c48_14, %c0_15] : memref<72x768xf32, #tpu.memory_space<vmem>>, vector<8x384xf32>
    tpu.vector_store %arg5[%c48_14, %c0_15], %18 {strides = array<i32>} : memref<72x768xf32, #tpu.memory_space<vmem>>, vector<8x384xf32>,
    %20 = vector.extract_strided_slice %17 {offsets = [0, 1], sizes = [8, 384], strides = [1, 1]} : vector<8x386xf32> to vector<8x384xf32>
    %c56 = arith.constant 56 : index
    %c0_16 = arith.constant 0 : index
    %21 = vector.load %arg5[%c56, %c0_16] : memref<72x768xf32, #tpu.memory_space<vmem>>, vector<8x384xf32>
    tpu.vector_store %arg5[%c56, %c0_16], %20 {strides = array<i32>} : memref<72x768xf32, #tpu.memory_space<vmem>>, vector<8x384xf32>,
    %22 = vector.extract_strided_slice %17 {offsets = [0, 2], sizes = [8, 384], strides = [1, 1]} : vector<8x386xf32> to vector<8x384xf32>
    %c64 = arith.constant 64 : index
    %c0_17 = arith.constant 0 : index
    %23 = vector.load %arg5[%c64, %c0_17] : memref<72x768xf32, #tpu.memory_space<vmem>>, vector<8x384xf32>
    tpu.vector_store %arg5[%c64, %c0_17], %22 {strides = array<i32>} : memref<72x768xf32, #tpu.memory_space<vmem>>, vector<8x384xf32>,
    %c1 = arith.constant 1 : index
    %c0_18 = arith.constant 0 : index
    %c0_19 = arith.constant 0 : index
    %24 = vector.load %arg1[%c1, %c0_18, %c0_19] : memref<2x8x456xf32, #tpu.memory_space<vmem>>, vector<1x8x386xf32>
    %25 = vector.shape_cast %24 : vector<1x8x386xf32> to vector<8x386xf32>
    %26 = vector.extract_strided_slice %25 {offsets = [0, 0], sizes = [8, 384], strides = [1, 1]} : vector<8x386xf32> to vector<8x384xf32>
    %c0_20 = arith.constant 0 : index
    %c384 = arith.constant 384 : index
    %27 = vector.load %arg5[%c0_20, %c384] : memref<72x768xf32, #tpu.memory_space<vmem>>, vector<8x384xf32>
    tpu.vector_store %arg5[%c0_20, %c384], %26 {strides = array<i32>} : memref<72x768xf32, #tpu.memory_space<vmem>>, vector<8x384xf32>,
    %28 = vector.extract_strided_slice %25 {offsets = [0, 1], sizes = [8, 384], strides = [1, 1]} : vector<8x386xf32> to vector<8x384xf32>
    %c8_21 = arith.constant 8 : index
    %c384_22 = arith.constant 384 : index
    %29 = vector.load %arg5[%c8_21, %c384_22] : memref<72x768xf32, #tpu.memory_space<vmem>>, vector<8x384xf32>
    tpu.vector_store %arg5[%c8_21, %c384_22], %28 {strides = array<i32>} : memref<72x768xf32, #tpu.memory_space<vmem>>, vector<8x384xf32>,
    %30 = vector.extract_strided_slice %25 {offsets = [0, 2], sizes = [8, 384], strides = [1, 1]} : vector<8x386xf32> to vector<8x384xf32>
    %c16_23 = arith.constant 16 : index
    %c384_24 = arith.constant 384 : index
    %31 = vector.load %arg5[%c16_23, %c384_24] : memref<72x768xf32, #tpu.memory_space<vmem>>, vector<8x384xf32>
    tpu.vector_store %arg5[%c16_23, %c384_24], %30 {strides = array<i32>} : memref<72x768xf32, #tpu.memory_space<vmem>>, vector<8x384xf32>,
    %c1_25 = arith.constant 1 : index
    %c0_26 = arith.constant 0 : index
    %c24_27 = arith.constant 24 : index
    %32 = vector.load %arg1[%c1_25, %c0_26, %c24_27] : memref<2x8x456xf32, #tpu.memory_space<vmem>>, vector<1x8x386xf32>
    %33 = vector.shape_cast %32 : vector<1x8x386xf32> to vector<8x386xf32>
    %34 = vector.extract_strided_slice %33 {offsets = [0, 0], sizes = [8, 384], strides = [1, 1]} : vector<8x386xf32> to vector<8x384xf32>
    %c24_28 = arith.constant 24 : index
    %c384_29 = arith.constant 384 : index
    %35 = vector.load %arg5[%c24_28, %c384_29] : memref<72x768xf32, #tpu.memory_space<vmem>>, vector<8x384xf32>
    tpu.vector_store %arg5[%c24_28, %c384_29], %34 {strides = array<i32>} : memref<72x768xf32, #tpu.memory_space<vmem>>, vector<8x384xf32>,
    %36 = vector.extract_strided_slice %33 {offsets = [0, 1], sizes = [8, 384], strides = [1, 1]} : vector<8x386xf32> to vector<8x384xf32>
    %c32_30 = arith.constant 32 : index
    %c384_31 = arith.constant 384 : index
    %37 = vector.load %arg5[%c32_30, %c384_31] : memref<72x768xf32, #tpu.memory_space<vmem>>, vector<8x384xf32>
    tpu.vector_store %arg5[%c32_30, %c384_31], %36 {strides = array<i32>} : memref<72x768xf32, #tpu.memory_space<vmem>>, vector<8x384xf32>,
    %38 = vector.extract_strided_slice %33 {offsets = [0, 2], sizes = [8, 384], strides = [1, 1]} : vector<8x386xf32> to vector<8x384xf32>
    %c40_32 = arith.constant 40 : index
    %c384_33 = arith.constant 384 : index
    %39 = vector.load %arg5[%c40_32, %c384_33] : memref<72x768xf32, #tpu.memory_space<vmem>>, vector<8x384xf32>
    tpu.vector_store %arg5[%c40_32, %c384_33], %38 {strides = array<i32>} : memref<72x768xf32, #tpu.memory_space<vmem>>, vector<8x384xf32>,
    %c1_34 = arith.constant 1 : index
    %c0_35 = arith.constant 0 : index
    %c48_36 = arith.constant 48 : index
    %40 = vector.load %arg1[%c1_34, %c0_35, %c48_36] : memref<2x8x456xf32, #tpu.memory_space<vmem>>, vector<1x8x386xf32>
    %41 = vector.shape_cast %40 : vector<1x8x386xf32> to vector<8x386xf32>
    %42 = vector.extract_strided_slice %41 {offsets = [0, 0], sizes = [8, 384], strides = [1, 1]} : vector<8x386xf32> to vector<8x384xf32>
    %c48_37 = arith.constant 48 : index
    %c384_38 = arith.constant 384 : index
    %43 = vector.load %arg5[%c48_37, %c384_38] : memref<72x768xf32, #tpu.memory_space<vmem>>, vector<8x384xf32>
    tpu.vector_store %arg5[%c48_37, %c384_38], %42 {strides = array<i32>} : memref<72x768xf32, #tpu.memory_space<vmem>>, vector<8x384xf32>,
    %44 = vector.extract_strided_slice %41 {offsets = [0, 1], sizes = [8, 384], strides = [1, 1]} : vector<8x386xf32> to vector<8x384xf32>
    %c56_39 = arith.constant 56 : index
    %c384_40 = arith.constant 384 : index
    %45 = vector.load %arg5[%c56_39, %c384_40] : memref<72x768xf32, #tpu.memory_space<vmem>>, vector<8x384xf32>
    tpu.vector_store %arg5[%c56_39, %c384_40], %44 {strides = array<i32>} : memref<72x768xf32, #tpu.memory_space<vmem>>, vector<8x384xf32>,
    %46 = vector.extract_strided_slice %41 {offsets = [0, 2], sizes = [8, 384], strides = [1, 1]} : vector<8x386xf32> to vector<8x384xf32>
    %c64_41 = arith.constant 64 : index
    %c384_42 = arith.constant 384 : index
    %47 = vector.load %arg5[%c64_41, %c384_42] : memref<72x768xf32, #tpu.memory_space<vmem>>, vector<8x384xf32>
    tpu.vector_store %arg5[%c64_41, %c384_42], %46 {strides = array<i32>} : memref<72x768xf32, #tpu.memory_space<vmem>>, vector<8x384xf32>,
    %c0_43 = arith.constant 0 : index
    %c0_44 = arith.constant 0 : index
    %48 = vector.load %arg2[%c0_43, %c0_44] : memref<8x72xf32, #tpu.memory_space<vmem>>, vector<8x72xf32>
    %c0_45 = arith.constant 0 : index
    %c0_46 = arith.constant 0 : index
    %49 = vector.load %arg5[%c0_45, %c0_46] : memref<72x768xf32, #tpu.memory_space<vmem>>, vector<72x768xf32>
    %cst = arith.constant dense<0.000000e+00> : vector<8x768xf32>
    %50 = tpu.matmul %48, %49, %cst {dimension_numbers = #tpu.dot_dimension_numbers<[1], [0], [0], [1], [0, 0, 1, 1], [], []>} : vector<8x72xf32>, vector<72x768xf32>, vector<8x768xf32> -> vector<8x768xf32>
    %c0_47 = arith.constant 0 : index
    %c0_48 = arith.constant 0 : index
    %51 = vector.load %arg3[%c0_47, %c0_48] : memref<8x1xf32, #tpu.memory_space<vmem>>, vector<8x1xf32>
    %52 = vector.broadcast %51 : vector<8x1xf32> to vector<8x768xf32>
    %53 = arith.addf %50, %52 : vector<8x768xf32>
    %54 = vector.extract_strided_slice %53 {offsets = [0, 0], sizes = [8, 384], strides = [1, 1]} : vector<8x768xf32> to vector<8x384xf32>
    %c0_49 = arith.constant 0 : index
    %c0_50 = arith.constant 0 : index
    %c0_51 = arith.constant 0 : index
    %55 = vector.load %arg4[%c0_49, %c0_50, %c0_51] : memref<2x8x384xf32, #tpu.memory_space<vmem>>, vector<1x8x384xf32>
    %56 = vector.shape_cast %55 : vector<1x8x384xf32> to vector<8x384xf32>
    %57 = vector.shape_cast %54 : vector<8x384xf32> to vector<1x8x384xf32>
    tpu.vector_store %arg4[%c0_49, %c0_50, %c0_51], %57 {strides = array<i32>} : memref<2x8x384xf32, #tpu.memory_space<vmem>>, vector<1x8x384xf32>,
    %58 = vector.extract_strided_slice %53 {offsets = [0, 384], sizes = [8, 384], strides = [1, 1]} : vector<8x768xf32> to vector<8x384xf32>
    %c1_52 = arith.constant 1 : index
    %c0_53 = arith.constant 0 : index
    %c0_54 = arith.constant 0 : index
    %59 = vector.load %arg4[%c1_52, %c0_53, %c0_54] : memref<2x8x384xf32, #tpu.memory_space<vmem>>, vector<1x8x384xf32>
    %60 = vector.shape_cast %59 : vector<1x8x384xf32> to vector<8x384xf32>
    %61 = vector.shape_cast %58 : vector<8x384xf32> to vector<1x8x384xf32>
    tpu.vector_store %arg4[%c1_52, %c0_53, %c0_54], %61 {strides = array<i32>} : memref<2x8x384xf32, #tpu.memory_space<vmem>>, vector<1x8x384xf32>,
    return
  }
  func.func @transform_0(%arg0: i32) -> (i32, i32, i32) {
    %c0_i32 = arith.constant 0 : i32
    %c0_i32_0 = arith.constant 0 : i32
    %c0_i32_1 = arith.constant 0 : i32
    return %arg0, %c0_i32, %c0_i32_0 : i32, i32, i32
  }
  func.func @transform_1(%arg0: i32) -> (i32, i32) {
    %c0_i32 = arith.constant 0 : i32
    %c0_i32_0 = arith.constant 0 : i32
    %c0_i32_1 = arith.constant 0 : i32
    return %c0_i32, %c0_i32_0 : i32, i32
  }
  func.func @transform_2(%arg0: i32) -> (i32, i32) {
    %c0_i32 = arith.constant 0 : i32
    %c0_i32_0 = arith.constant 0 : i32
    %c0_i32_1 = arith.constant 0 : i32
    return %c0_i32, %c0_i32_0 : i32, i32
  }
  func.func @transform_3(%arg0: i32) -> (i32, i32, i32) {
    %c0_i32 = arith.constant 0 : i32
    %c0_i32_0 = arith.constant 0 : i32
    %c0_i32_1 = arith.constant 0 : i32
    return %arg0, %c0_i32, %c0_i32_0 : i32, i32, i32
  }
}

</mosaic_0001>

<bundles_post_ra>
// kernel: tpu_custom_call.1
= control target key start
LH: loop header
LB: loop body
LE: loop exit
PB: predicated region body
PF: predicated region fallthrough
CT: control target
= control target key end

     0   :  { %8 = vsyncpa [#allocation4], 0  ;;  %s999_s0 = inlined_call_operand.hbm [shape: f32[2,8,456], index: 0, kind: input, shape index: {}]   ;;  %s1000_s1 = inlined_call_operand.vmem [shape: f32[8,72], index: 1, kind: input, shape index: {}]   ;;  %s1001_s2 = inlined_call_operand.vmem [shape: f32[8,1], index: 2, kind: input, shape index: {}]   ;;  %s1002_s3 = inlined_call_operand.hbm [shape: f32[2,8,384], index: 3, kind: output, shape index: {}]  }
   0x1   :  { %9 = vsyncpa [#allocation5], 0  ;;  %s730_s12 = smov [#allocation3]  }
   0x2   :  { %s15_s13 = sshll.u32 %s730_s12, 4  ;;  %s16_s13 = int_to_ptr.vmem [resolvable:$true] %s15_s13 }
   0x3   :  { %s694_s14 = scalar_lea.vmem %s16_s13, 1024  ;;  %p699_p1 = scmp.lt.s32.totalorder %s16_s13, %s16_s13 }
   0x4   :  { %p695_p0 = scmp.ne.s32.totalorder %s16_s13, %s694_s14  ;;  %p700_p2 = scmp.lt.s32.totalorder %s694_s14, %s694_s14 }
   0x6   :  { %p701_p3 = por %p700_p2, %p699_p1 }
   0x8   :  { %p702_p4 = pnand %p701_p3, %p695_p0 }
   0xa   :  { %705 = shalt.err (!%p702_p4)
}
   0xb   :  { %s731_s15 = smov 512   ;;  %s732_s16 = smov 32  }
   0xc   :  { %21 = dma.hbm_to_vmem [thread:$0]  %s999_s0, 1024, %s16_s13, [#allocation4], %s731_s15, %s731_s15, %s732_s16  }
   0xd   :  { %726 = dma.done.wait [#allocation4], 1024  }
   0xe   :  { %727 = vsyncadd [#allocation4], 4294966272  ;;  %v769_v0 = vld [vmem:[#allocation3 + $0x8] sm:$0xff]  ;;  %v771_v1 = vld [vmem:[#allocation3] sm:$0xff]  ;;  %s733_s19 = smov 78   ;;  %s734_s20 = smov 79  }
   0xf   :  { %184 = vrot.lane.b32.xlu0 %v769_v0, %s733_s19  ;;  %182 = vrot.lane.b32.xlu1 %v771_v1, %s733_s19  ;;  %v777_v2 = vld [vmem:[#allocation3 + $0x10] sm:$0xff]  ;;  %s735_s0 = smov 80   ;;  %s736_s21 = smov 102   ;;  %v741_v3 = vmov 0.0   ;;  %v825_v4 = vld [vmem:[#allocation3 + $0x28] sm:$0xff]  ;;  %v827_v5 = vld [vmem:[#allocation3 + $0x20] sm:$0xff] }
  0x10   :  { %s737_s22 = smov 103   ;;  %s738_s23 = smov 104   ;;  %493 = vmatprep.mubr.f32.mxu0 %v741_v3  ;;  %564 = vmatprep.mubr.f32.mxu1 %v741_v3  ;;  %v308_v6 = vld [vmem:[#allocation3 + $0x38] sm:$0xff]  ;;  %v833_v7 = vld [vmem:[#allocation3 + $0x30] sm:$0xff]  ;;  %vm190_vm0 = vcmask 637952   ;;  %v742_v13 = vmov 0  }
  0x11   :  { %s739_s24 = smov 126   ;;  %s740_s25 = smov 127   ;;  %v141_v8 = vld [vmem:[#allocation3 + $0x18] sm:$0xff]  ;;  %685 = vset.pattern.permute.xlu0 %v742_v13  ;;  %vm172_vm1 = vcmask 646144   ;;  %vm154_vm2 = vcmask 654336   ;;  %v419_v22 = vld [vmem:[%s1001_s2] sm:$0xff] }
  0x12   :  { %vm128_vm3 = vcmask 834560   ;;  %vm110_vm4 = vcmask 842752   ;;  %vm92_vm5 = vcmask 850944   ;;  %vm66_vm6 = vcmask 1031168   ;;  %v941_v51 = vld [vmem:[%s1000_s1] sm:$0xff]  ;;  %s743_s1 = smov [#allocation6]  }
  0x13   :  { %186 = vrot.lane.b32.xlu0 %v777_v2, %s733_s19  ;;  %166 = vrot.lane.b32.xlu1 %v769_v0, %s734_s20  ;;  %vm48_vm7 = vcmask 1039360   ;;  %vm425_vm8 = vcmask 588800   ;;  %s654_s29 = sshll.u32 %s743_s1, 4  ;;  %s655_s29 = int_to_ptr.vmem [resolvable:$true] %s654_s29 }
  0x14   :  { %s706_s30 = scalar_lea.vmem %s655_s29, 768  ;;  %p711_p6 = scmp.lt.s32.totalorder %s655_s29, %s655_s29 }
  0x15   :  { %p707_p5 = scmp.ne.s32.totalorder %s655_s29, %s706_s30  ;;  %p712_p7 = scmp.lt.s32.totalorder %s706_s30, %s706_s30 }
  0x17   :  { %168 = vrot.lane.b32.xlu0 %v777_v2, %s734_s20  ;;  %164 = vrot.lane.b32.xlu1 %v771_v1, %s734_s20  ;;  %p713_p8 = por %p712_p7, %p711_p6 }
  0x19   :  { %p714_p9 = pnand %p713_p8, %p707_p5 }
  0x1b   :  { %148 = vrot.lane.b32.xlu0 %v769_v0, %s735_s0  ;;  %150 = vrot.lane.b32.xlu1 %v777_v2, %s735_s0 }
  0x1f   :  { %146 = vrot.lane.b32.xlu0 %v771_v1, %s735_s0  ;;  %122 = vrot.lane.b32.xlu1 %v769_v0, %s736_s21 }
  0x23   :  { %124 = vrot.lane.b32.xlu0 %v777_v2, %s736_s21  ;;  %120 = vrot.lane.b32.xlu1 %v771_v1, %s736_s21 }
  0x27   :  { %104 = vrot.lane.b32.xlu0 %v769_v0, %s737_s22  ;;  %106 = vrot.lane.b32.xlu1 %v777_v2, %s737_s22 }
  0x2b   :  { %102 = vrot.lane.b32.xlu0 %v771_v1, %s737_s22  ;;  %86 = vrot.lane.b32.xlu1 %v769_v0, %s738_s23 }
  0x2f   :  { %88 = vrot.lane.b32.xlu0 %v777_v2, %s738_s23  ;;  %84 = vrot.lane.b32.xlu1 %v771_v1, %s738_s23 }
  0x33   :  { %62 = vrot.lane.b32.xlu1 %v777_v2, %s739_s24  ;;  %60 = vrot.lane.b32.xlu0 %v769_v0, %s739_s24 }
  0x37   :  { %42 = vrot.lane.b32.xlu1 %v769_v0, %s740_s25  ;;  %58 = vrot.lane.b32.xlu0 %v771_v1, %s739_s24 }
  0x3b   :  { %40 = vrot.lane.b32.xlu1 %v771_v1, %s740_s25  ;;  %44 = vrot.lane.b32.xlu0 %v777_v2, %s740_s25 }
  0x3f   :  { %349 = vrot.lane.b32.xlu1 %v825_v4, %s733_s19  ;;  %347 = vrot.lane.b32.xlu0 %v827_v5, %s733_s19 }
  0x43   :  { %353 = vrot.lane.b32.xlu1 %v308_v6, %s733_s19  ;;  %351 = vrot.lane.b32.xlu0 %v833_v7, %s733_s19 }
  0x47   :  { %330 = vrot.lane.b32.xlu1 %v827_v5, %s734_s20  ;;  %188 = vrot.lane.b32.xlu0 %v141_v8, %s733_s19 }
  0x4b   :  { %334 = vrot.lane.b32.xlu1 %v833_v7, %s734_s20  ;;  %332 = vrot.lane.b32.xlu0 %v825_v4, %s734_s20 }
  0x4f   :  { %170 = vrot.lane.b32.xlu1 %v141_v8, %s734_s20  ;;  %336 = vrot.lane.b32.xlu0 %v308_v6, %s734_s20 }
  0x53   :  { %315 = vrot.lane.b32.xlu1 %v825_v4, %s735_s0  ;;  %313 = vrot.lane.b32.xlu0 %v827_v5, %s735_s0 }
  0x57   :  { %319 = vrot.lane.b32.xlu1 %v308_v6, %s735_s0  ;;  %317 = vrot.lane.b32.xlu0 %v833_v7, %s735_s0 }
  0x5b   :  { %288 = vrot.lane.b32.xlu1 %v827_v5, %s736_s21  ;;  %152 = vrot.lane.b32.xlu0 %v141_v8, %s735_s0 }
  0x5f   :  { %292 = vrot.lane.b32.xlu1 %v833_v7, %s736_s21  ;;  %290 = vrot.lane.b32.xlu0 %v825_v4, %s736_s21 }
  0x63   :  { %126 = vrot.lane.b32.xlu1 %v141_v8, %s736_s21  ;;  %294 = vrot.lane.b32.xlu0 %v308_v6, %s736_s21 }
  0x67   :  { %273 = vrot.lane.b32.xlu1 %v825_v4, %s737_s22  ;;  %271 = vrot.lane.b32.xlu0 %v827_v5, %s737_s22 }
  0x6b   :  { %277 = vrot.lane.b32.xlu1 %v308_v6, %s737_s22  ;;  %275 = vrot.lane.b32.xlu0 %v833_v7, %s737_s22 }
  0x6f   :  { %254 = vrot.lane.b32.xlu1 %v827_v5, %s738_s23  ;;  %108 = vrot.lane.b32.xlu0 %v141_v8, %s737_s22 }
  0x73   :  { %258 = vrot.lane.b32.xlu1 %v833_v7, %s738_s23  ;;  %256 = vrot.lane.b32.xlu0 %v825_v4, %s738_s23 }
  0x77   :  { %90 = vrot.lane.b32.xlu1 %v141_v8, %s738_s23  ;;  %260 = vrot.lane.b32.xlu0 %v308_v6, %s738_s23 }
  0x7b   :  { %231 = vrot.lane.b32.xlu1 %v825_v4, %s739_s24  ;;  %229 = vrot.lane.b32.xlu0 %v827_v5, %s739_s24 }
  0x7f   :  { %235 = vrot.lane.b32.xlu1 %v308_v6, %s739_s24  ;;  %233 = vrot.lane.b32.xlu0 %v833_v7, %s739_s24 }
  0x81   :  { %v185_v9 = vpop.permute.xlu0 %184  ;;  %v183_v10 = vpop.permute.xlu1 %182 }
  0x82   :  { %v191_v15 = vsel %vm190_vm0, %v183_v10, %v185_v9 }
  0x83   :  { %212 = vrot.lane.b32.xlu1 %v827_v5, %s740_s25  ;;  %64 = vrot.lane.b32.xlu0 %v141_v8, %s739_s24 }
  0x85   :  { %v889_v11 = vpop.permute.xlu0 %186  ;;  %v167_v12 = vpop.permute.xlu1 %166 }
  0x86   :  { %v192_v14 = vsel %vm190_vm0, %v185_v9, %v889_v11 }
  0x87   :  { %443 = vmatprep.subr.mxu0 %v192_v14  ;;  %216 = vrot.lane.b32.xlu1 %v833_v7, %s740_s25 }
  0x88   :  { %214 = vrot.lane.b32.xlu0 %v825_v4, %s740_s25  ;;  %444 = vmatpush1.msra.mxu0 %v191_v15 }
  0x89   :  { %v898_v16 = vpop.permute.xlu0 %168  ;;  %v165_v17 = vpop.permute.xlu1 %164 }
  0x8a   :  { %v174_v18 = vsel %vm172_vm1, %v167_v12, %v898_v16  ;;  %v173_v19 = vsel %vm172_vm1, %v165_v17, %v167_v12 }
  0x8b   :  { %445 = vmatprep.subr.mxu0 %v174_v18  ;;  %46 = vrot.lane.b32.xlu1 %v141_v8, %s740_s25 }
  0x8c   :  { %218 = vrot.lane.b32.xlu0 %v308_v6, %s740_s25  ;;  %446 = vmatpush1.msra.mxu0 %v173_v19 }
  0x8d   :  { %v149_v20 = vpop.permute.xlu0 %148  ;;  %v905_v21 = vpop.permute.xlu1 %150 }
  0x8e   :  { %v156_v23 = vsel %vm154_vm2, %v149_v20, %v905_v21 }
  0x8f   :  { %447 = vmatprep.subr.mxu0 %v156_v23 }
  0x90   :  { %422 = vperm.xlu0 %685, %v419_v22  }
  0x91   :  { %v147_v24 = vpop.permute.xlu0 %146  ;;  %v123_v25 = vpop.permute.xlu1 %122 }
  0x92   :  { %v155_v26 = vsel %vm154_vm2, %v147_v24, %v149_v20 }
  0x93   :  { %448 = vmatpush1.msra.mxu0 %v155_v26 }
  0x95   :  { %v913_v27 = vpop.permute.xlu0 %124  ;;  %v121_v28 = vpop.permute.xlu1 %120 }
  0x96   :  { %v130_v29 = vsel %vm128_vm3, %v123_v25, %v913_v27  ;;  %v129_v30 = vsel %vm128_vm3, %v121_v28, %v123_v25 }
  0x97   :  { %449 = vmatprep.subr.mxu0 %v130_v29 }
  0x98   :  { %450 = vmatpush1.msra.mxu0 %v129_v30 }
  0x99   :  { %v105_v31 = vpop.permute.xlu0 %104  ;;  %v918_v32 = vpop.permute.xlu1 %106 }
  0x9a   :  { %v112_v33 = vsel %vm110_vm4, %v105_v31, %v918_v32 }
  0x9b   :  { %451 = vmatprep.subr.mxu0 %v112_v33 }
  0x9d   :  { %v103_v34 = vpop.permute.xlu0 %102  ;;  %v87_v35 = vpop.permute.xlu1 %86 }
  0x9e   :  { %v111_v36 = vsel %vm110_vm4, %v103_v34, %v105_v31 }
  0x9f   :  { %452 = vmatpush1.msra.mxu0 %v111_v36 }
  0xa1   :  { %v923_v37 = vpop.permute.xlu0 %88  ;;  %v85_v38 = vpop.permute.xlu1 %84 }
  0xa2   :  { %v94_v39 = vsel %vm92_vm5, %v87_v35, %v923_v37  ;;  %v93_v40 = vsel %vm92_vm5, %v85_v38, %v87_v35 }
  0xa3   :  { %453 = vmatprep.subr.mxu0 %v94_v39 }
  0xa4   :  { %454 = vmatpush1.msra.mxu0 %v93_v40 }
  0xa5   :  { %v928_v41 = vpop.permute.xlu1 %62  ;;  %v61_v42 = vpop.permute.xlu0 %60 }
  0xa6   :  { %v68_v43 = vsel %vm66_vm6, %v61_v42, %v928_v41 }
  0xa7   :  { %455 = vmatprep.subr.mxu0 %v68_v43 }
  0xa9   :  { %v43_v44 = vpop.permute.xlu1 %42  ;;  %v59_v45 = vpop.permute.xlu0 %58 }
  0xaa   :  { %v67_v46 = vsel %vm66_vm6, %v59_v45, %v61_v42 }
  0xab   :  { %456 = vmatpush1.msra.mxu0 %v67_v46 }
  0xad   :  { %v41_v47 = vpop.permute.xlu1 %40  ;;  %v933_v48 = vpop.permute.xlu0 %44 }
  0xae   :  { %v50_v49 = vsel %vm48_vm7, %v43_v44, %v933_v48  ;;  %v49_v50 = vsel %vm48_vm7, %v41_v47, %v43_v44 }
  0xaf   :  { %457 = vmatprep.subr.mxu0 %v50_v49 }
  0xb0   :  { %458 = vmatpush1.msra.mxu0 %v49_v50 }
  0xb1   :  { %v350_v52 = vpop.permute.xlu1 %349  ;;  %v348_v53 = vpop.permute.xlu0 %347  ;;  %459 = vmatprep.subr.mxu0 %v769_v0 }
  0xb2   :  { %v355_v54 = vsel %vm190_vm0, %v348_v53, %v350_v52  ;;  %460 = vmatpush1.msra.mxu0 %v771_v1 }
  0xb3   :  { %514 = vmatprep.subr.mxu1 %v355_v54  ;;  %666 = vmatmul.mubr.msk.f32.vlgmr.msra.gmra.mxu0 %vm425_vm8, %v941_v51 }
  0xb4   :  { %635 = vmatprep.mubr.f32.mxu0 %v741_v3 }
  0xb5   :  { %v354_v55 = vpop.permute.xlu1 %353  ;;  %v352_v56 = vpop.permute.xlu0 %351 }
  0xb6   :  { %v356_v57 = vsel %vm190_vm0, %v350_v52, %v352_v56  ;;  %v357_v58 = vsel %vm190_vm0, %v352_v56, %v354_v55 }
  0xb7   :  { %585 = vmatprep.subr.mxu0 %v357_v58 }
  0xb8   :  { %586 = vmatpush1.msra.mxu0 %v356_v57 }
  0xb9   :  { %v331_v59 = vpop.permute.xlu1 %330  ;;  %v189_v60 = vpop.permute.xlu0 %188 }
  0xba   :  { %v193_v61 = vsel %vm190_vm0, %v889_v11, %v189_v60 }
  0xbb   :  { %515 = vmatpush1.msra.mxu1 %v193_v61 }
  0xbd   :  { %v335_v62 = vpop.permute.xlu1 %334  ;;  %v333_v63 = vpop.permute.xlu0 %332 }
  0xbe   :  { %v338_v0 = vsel %vm172_vm1, %v331_v59, %v333_v63  ;;  %v339_v9 = vsel %vm172_vm1, %v333_v63, %v335_v62 }
  0xbf   :  { %516 = vmatprep.subr.mxu1 %v338_v0 }
  0xc1   :  { %v171_v1 = vpop.permute.xlu1 %170  ;;  %v337_v3 = vpop.permute.xlu0 %336 }
  0xc2   :  { %v175_v6 = vsel %vm172_vm1, %v898_v16, %v171_v1  ;;  %v340_v8 = vsel %vm172_vm1, %v335_v62, %v337_v3 }
  0xc3   :  { %517 = vmatpush1.msra.mxu1 %v175_v6  ;;  %587 = vmatprep.subr.mxu0 %v340_v8 }
  0xc4   :  { %588 = vmatpush1.msra.mxu0 %v339_v9 }
  0xc5   :  { %v316_v10 = vpop.permute.xlu1 %315  ;;  %v314_v11 = vpop.permute.xlu0 %313 }
  0xc6   :  { %v321_v12 = vsel %vm154_vm2, %v314_v11, %v316_v10 }
  0xc7   :  { %518 = vmatprep.subr.mxu1 %v321_v12 }
  0xc9   :  { %v320_v13 = vpop.permute.xlu1 %319  ;;  %v318_v14 = vpop.permute.xlu0 %317 }
  0xca   :  { %v322_v15 = vsel %vm154_vm2, %v316_v10, %v318_v14  ;;  %v323_v17 = vsel %vm154_vm2, %v318_v14, %v320_v13 }
  0xcb   :  { %589 = vmatprep.subr.mxu0 %v323_v17 }
  0xcc   :  { %590 = vmatpush1.msra.mxu0 %v322_v15 }
  0xcd   :  { %v289_v16 = vpop.permute.xlu1 %288  ;;  %v153_v18 = vpop.permute.xlu0 %152 }
  0xce   :  { %v157_v19 = vsel %vm154_vm2, %v905_v21, %v153_v18 }
  0xcf   :  { %519 = vmatpush1.msra.mxu1 %v157_v19 }
  0xd1   :  { %v293_v20 = vpop.permute.xlu1 %292  ;;  %v291_v22 = vpop.permute.xlu0 %290 }
  0xd2   :  { %v296_v23 = vsel %vm128_vm3, %v289_v16, %v291_v22  ;;  %v297_v29 = vsel %vm128_vm3, %v291_v22, %v293_v20 }
  0xd3   :  { %520 = vmatprep.subr.mxu1 %v296_v23 }
  0xd5   :  { %v127_v24 = vpop.permute.xlu1 %126  ;;  %v295_v25 = vpop.permute.xlu0 %294 }
  0xd6   :  { %v131_v26 = vsel %vm128_vm3, %v913_v27, %v127_v24  ;;  %v298_v28 = vsel %vm128_vm3, %v293_v20, %v295_v25 }
  0xd7   :  { %521 = vmatpush1.msra.mxu1 %v131_v26  ;;  %591 = vmatprep.subr.mxu0 %v298_v28 }
  0xd8   :  { %592 = vmatpush1.msra.mxu0 %v297_v29 }
  0xd9   :  { %v274_v30 = vpop.permute.xlu1 %273  ;;  %v272_v21 = vpop.permute.xlu0 %271 }
  0xda   :  { %v279_v31 = vsel %vm110_vm4, %v272_v21, %v274_v30 }
  0xdb   :  { %522 = vmatprep.subr.mxu1 %v279_v31 }
  0xdd   :  { %v278_v33 = vpop.permute.xlu1 %277  ;;  %v276_v34 = vpop.permute.xlu0 %275 }
  0xde   :  { %v280_v35 = vsel %vm110_vm4, %v274_v30, %v276_v34  ;;  %v281_v36 = vsel %vm110_vm4, %v276_v34, %v278_v33 }
  0xdf   :  { %593 = vmatprep.subr.mxu0 %v281_v36 }
  0xe0   :  { %594 = vmatpush1.msra.mxu0 %v280_v35 }
  0xe1   :  { %v255_v27 = vpop.permute.xlu1 %254  ;;  %v109_v38 = vpop.permute.xlu0 %108 }
  0xe2   :  { %v113_v39 = vsel %vm110_vm4, %v918_v32, %v109_v38 }
  0xe3   :  { %523 = vmatpush1.msra.mxu1 %v113_v39 }
  0xe5   :  { %v259_v40 = vpop.permute.xlu1 %258  ;;  %v257_v42 = vpop.permute.xlu0 %256 }
  0xe6   :  { %v262_v43 = vsel %vm92_vm5, %v255_v27, %v257_v42  ;;  %v263_v49 = vsel %vm92_vm5, %v257_v42, %v259_v40 }
  0xe7   :  { %524 = vmatprep.subr.mxu1 %v262_v43 }
  0xe9   :  { %v91_v44 = vpop.permute.xlu1 %90  ;;  %v261_v45 = vpop.permute.xlu0 %260 }
  0xea   :  { %v95_v46 = vsel %vm92_vm5, %v923_v37, %v91_v44  ;;  %v264_v47 = vsel %vm92_vm5, %v259_v40, %v261_v45 }
  0xeb   :  { %525 = vmatpush1.msra.mxu1 %v95_v46  ;;  %595 = vmatprep.subr.mxu0 %v264_v47 }
  0xec   :  { %596 = vmatpush1.msra.mxu0 %v263_v49 }
  0xed   :  { %v232_v50 = vpop.permute.xlu1 %231  ;;  %v230_v32 = vpop.permute.xlu0 %229 }
  0xee   :  { %v237_v52 = vsel %vm66_vm6, %v230_v32, %v232_v50 }
  0xef   :  { %526 = vmatprep.subr.mxu1 %v237_v52 }
  0xf1   :  { %v236_v53 = vpop.permute.xlu1 %235  ;;  %v234_v54 = vpop.permute.xlu0 %233 }
  0xf2   :  { %v238_v55 = vsel %vm66_vm6, %v232_v50, %v234_v54  ;;  %v239_v56 = vsel %vm66_vm6, %v234_v54, %v236_v53 }
  0xf3   :  { %597 = vmatprep.subr.mxu0 %v239_v56 }
  0xf4   :  { %598 = vmatpush1.msra.mxu0 %v238_v55 }
  0xf5   :  { %v213_v37 = vpop.permute.xlu1 %212  ;;  %v65_v57 = vpop.permute.xlu0 %64 }
  0xf6   :  { %v69_v58 = vsel %vm66_vm6, %v928_v41, %v65_v57 }
  0xf7   :  { %527 = vmatpush1.msra.mxu1 %v69_v58 }
  0xf9   :  { %v217_v59 = vpop.permute.xlu1 %216 }
  0xfa   :  { %v215_v60 = vpop.permute.xlu0 %214 }
  0xfb   :  { %v220_v61 = vsel %vm48_vm7, %v213_v37, %v215_v60  ;;  %v221_v3 = vsel %vm48_vm7, %v215_v60, %v217_v59 }
  0xfc   :  { %528 = vmatprep.subr.mxu1 %v220_v61 }
  0xfd   :  { %v47_v62 = vpop.permute.xlu1 %46 }
  0xfe   :  { %v219_v63 = vpop.permute.xlu0 %218  ;;  %v51_v0 = vsel %vm48_vm7, %v933_v48, %v47_v62 }
  0xff   :  { %529 = vmatpush1.msra.mxu1 %v51_v0  ;;  %v222_v1 = vsel %vm48_vm7, %v217_v59, %v219_v63 }
 0x100   :  { %599 = vmatprep.subr.mxu0 %v222_v1  ;;  %530 = vmatprep.subr.mxu1 %v827_v5 }
 0x101   :  { %600 = vmatpush1.msra.mxu0 %v221_v3  ;;  %531 = vmatpush1.msra.mxu1 %v777_v2 }
 0x102   :  { %601 = vmatprep.subr.mxu0 %v833_v7  ;;  %667 = vmatmul.mubr.msk.f32.vlgmr.msra.gmra.mxu1 %vm425_vm8, %v941_v51 }
 0x103   :  { %602 = vmatpush1.msra.mxu0 %v825_v4 }
 0x104   :  { %668 = vmatmul.mubr.msk.f32.vlgmr.msra.gmra.mxu0 %vm425_vm8, %v941_v51 }
 0x10b   :  { %v423_v41 = vpop.permute.xlu0 %422 }
 0x173   :  { %v495_v48 = vpop.f32.mrf.mxu0 }
 0x174   :  { %v496_v6 = vadd.f32 %v495_v48, %v423_v41 }
 0x175   :  { %v497_v8 = vpop.f32.mrf.mxu0 }
 0x176   :  { %v498_v9 = vadd.f32 %v497_v8, %v423_v41  ;;  %642 = vst [vmem:[#allocation6] sm:$0xff] %v496_v6 }
 0x178   :  { %643 = vst [vmem:[#allocation6 + $0x8] sm:$0xff] %v498_v9 }
 0x1c2   :  { %v566_v5 = vpop.f32.mrf.mxu1 }
 0x1c3   :  { %v567_v10 = vadd.f32 %v566_v5, %v423_v41 }
 0x1c4   :  { %v637_v2 = vpop.f32.mrf.mxu0  ;;  %v568_v7 = vpop.f32.mrf.mxu1 }
 0x1c5   :  { %644 = vst [vmem:[#allocation6 + $0x10] sm:$0xff] %v567_v10  ;;  %v638_v11 = vadd.f32 %v637_v2, %v423_v41  ;;  %v569_v12 = vadd.f32 %v568_v7, %v423_v41 }
 0x1c6   :  { %v639_v4 = vpop.f32.mrf.mxu0 }
 0x1c7   :  { %647 = vst [vmem:[#allocation6 + $0x20] sm:$0xff] %v638_v11  ;;  %646 = vst [vmem:[#allocation6 + $0x18] sm:$0xff] %v569_v12  ;;  %v640_v51 = vadd.f32 %v639_v4, %v423_v41 }
 0x1c9   :  { %648 = vst [vmem:[#allocation6 + $0x28] sm:$0xff] %v640_v51 }
 0x1ca   :  { %717 = shalt.err (!%p714_p9)
}
 0x1cb   :  { %s744_s4 = smov 384   ;;  %s745_s5 = smov 24  }
 0x1cc   :  { %660 = dma.vmem_to_hbm [thread:$0]  %s655_s29, 768, %s1002_s3, [#allocation5], %s744_s4, %s744_s4, %s745_s5  }
 0x1cd   :  { %728 = dma.done.wait [#allocation5], 768  }
 0x1ce   :  { %729 = vsyncadd [#allocation5], 4294966528 }
 0x1cf   :  { %664 = vsyncpa [#allocation4], 1 }
 0x1d0   :  { %665 = vsyncpa [#allocation5], 1 }

</bundles_post_ra>
